<compile_context>
chip_gen: v7x
topology: tpu7x:2x2x1
jax: 0.10.0
libtpu: 0.0.40
codegen_flags: <defaults>
</compile_context>

<pallas_src>
import jax
import jax.numpy as jnp
from jax.experimental import pallas as pl
from jax.experimental.pallas import tpu as pltpu


def _bmm_kernel(v_ref, x_ref, o_ref):
    # v_ref : (M, K)        in SMEM  -- read as scalars
    # x_ref : (Bt, K, Nt)   in VMEM
    # o_ref : (Bt, M, Nt)   in VMEM
    M, K = v_ref.shape
    # Load each K-slice once; reuse across the M output rows (static unroll: K=3, M=2).
    xk = [x_ref[:, k, :] for k in range(K)]
    for m in range(M):
        acc = v_ref[m, 0] * xk[0]
        for k in range(1, K):
            acc = acc + v_ref[m, k] * xk[k]
        o_ref[:, m, :] = acc.astype(o_ref.dtype)


def model_forward(v1, x1, x2=None):
    """Pallas equivalent of Model.forward. x2 is unused (matches PyTorch)."""
    del x2
    B, K, N = x1.shape
    M, Kv = v1.shape
    assert K == Kv, f"inner-dim mismatch: v1 {v1.shape} vs x1 {x1.shape}"

    # Batch tile: large enough to amortize per-step overhead, small enough for VMEM.
    Bt = min(B, 128)
    # Lane tile: full N when small (legal full-extent block even if not a multiple
    # of 128); otherwise a 512-lane tile (multiple of 128 -> unmasked, lane-dense).
    Nt = N if N <= 512 else 512

    grid = (pl.cdiv(B, Bt), pl.cdiv(N, Nt))

    return pl.pallas_call(
        _bmm_kernel,
        out_shape=jax.ShapeDtypeStruct((B, M, N), jnp.float32),
        grid_spec=pltpu.PrefetchScalarGridSpec(
            num_scalar_prefetch=0,
            grid=grid,
            in_specs=[
                # v1: whole (M, K) matrix resident in SMEM (scalar reads).
                pl.BlockSpec(memory_space=pltpu.MemorySpace.SMEM),
                # x1: (Bt, K, Nt) slab per grid step.
                pl.BlockSpec((Bt, K, Nt), lambda b, n: (b, 0, n)),
            ],
            out_specs=pl.BlockSpec((Bt, M, Nt), lambda b, n: (b, 0, n)),
        ),
        compiler_params=pltpu.CompilerParams(
            dimension_semantics=("parallel", "parallel"),
        ),
        cost_estimate=pl.CostEstimate(
            flops=2 * B * M * K * N,
            transcendentals=0,
            bytes_accessed=4 * (B * K * N + M * K + B * M * N),
        ),
    )(v1, x1)


if __name__ == "__main__":
    key = jax.random.PRNGKey(0)
    k_v, k_x1, k_x2 = jax.random.split(key, 3)

    # Deterministic parameter init: v1 ~ Uniform(-10, 10), shape (2, 3)
    v1 = jax.random.uniform(k_v, (2, 3), dtype=jnp.float32, minval=-10.0, maxval=10.0)

    # Small example inputs: batch=4, K=3, N=256 (N a multiple of 128 -> lane-dense)
    B, K, N = 4, 3, 256
    x1 = jax.random.normal(k_x1, (B, K, N), dtype=jnp.float32)
    x2 = jax.random.normal(k_x2, (B, K, N), dtype=jnp.float32)  # unused, as in PyTorch

    out = model_forward(v1, x1, x2)
    out = jax.block_until_ready(out)

    # Reference check in plain JAX (batched matmul with broadcast v1)
    ref = jnp.einsum("mk,bkn->bmn", v1, x1)
    assert out.shape == (B, 2, N), out.shape
    assert jnp.allclose(out, ref, atol=1e-5, rtol=1e-5), "mismatch vs reference"

    print("KERNEL_OK")
</pallas_src>

<mosaic_0001>
module attributes {stable_mosaic.version = 11 : i64} {
  func.func @_bmm_kernel(%arg0: i32, %arg1: i32, %arg2: memref<2x3xf32, #tpu.memory_space<smem>>, %arg3: memref<4x3x256xf32, #tpu.memory_space<vmem>>, %arg4: memref<4x2x256xf32, #tpu.memory_space<vmem>>) attributes {dimension_semantics = [#tpu.dimension_semantics<parallel>, #tpu.dimension_semantics<parallel>], iteration_bounds = array<i64: 1, 1>, scalar_prefetch = 0 : i64, scratch_operands = 0 : i64, tpu.core_type = #tpu.core_type<tc>, window_params = [{transform_indices = @transform_0, window_bounds = array<i64: 2, 3>}, {transform_indices = @transform_1, window_bounds = array<i64: 4, 3, 256>}, {transform_indices = @transform_2, window_bounds = array<i64: 4, 2, 256>}]} {
    %c0 = arith.constant 0 : index
    %c0_0 = arith.constant 0 : index
    %c0_1 = arith.constant 0 : index
    %0 = vector.load %arg3[%c0, %c0_0, %c0_1] : memref<4x3x256xf32, #tpu.memory_space<vmem>>, vector<4x1x256xf32>
    %1 = vector.shape_cast %0 : vector<4x1x256xf32> to vector<4x256xf32>
    %c0_2 = arith.constant 0 : index
    %c1 = arith.constant 1 : index
    %c0_3 = arith.constant 0 : index
    %2 = vector.load %arg3[%c0_2, %c1, %c0_3] : memref<4x3x256xf32, #tpu.memory_space<vmem>>, vector<4x1x256xf32>
    %3 = vector.shape_cast %2 : vector<4x1x256xf32> to vector<4x256xf32>
    %c0_4 = arith.constant 0 : index
    %c2 = arith.constant 2 : index
    %c0_5 = arith.constant 0 : index
    %4 = vector.load %arg3[%c0_4, %c2, %c0_5] : memref<4x3x256xf32, #tpu.memory_space<vmem>>, vector<4x1x256xf32>
    %5 = vector.shape_cast %4 : vector<4x1x256xf32> to vector<4x256xf32>
    %c0_6 = arith.constant 0 : index
    %c0_7 = arith.constant 0 : index
    %6 = memref.load %arg2[%c0_6, %c0_7] : memref<2x3xf32, #tpu.memory_space<smem>>
    %7 = vector.broadcast %6 : f32 to vector<4x256xf32>
    %8 = arith.mulf %7, %1 : vector<4x256xf32>
    %c0_8 = arith.constant 0 : index
    %c1_9 = arith.constant 1 : index
    %9 = memref.load %arg2[%c0_8, %c1_9] : memref<2x3xf32, #tpu.memory_space<smem>>
    %10 = vector.broadcast %9 : f32 to vector<4x256xf32>
    %11 = arith.mulf %10, %3 : vector<4x256xf32>
    %12 = arith.addf %8, %11 : vector<4x256xf32>
    %c0_10 = arith.constant 0 : index
    %c2_11 = arith.constant 2 : index
    %13 = memref.load %arg2[%c0_10, %c2_11] : memref<2x3xf32, #tpu.memory_space<smem>>
    %14 = vector.broadcast %13 : f32 to vector<4x256xf32>
    %15 = arith.mulf %14, %5 : vector<4x256xf32>
    %16 = arith.addf %12, %15 : vector<4x256xf32>
    %c0_12 = arith.constant 0 : index
    %c0_13 = arith.constant 0 : index
    %c0_14 = arith.constant 0 : index
    %17 = vector.load %arg4[%c0_12, %c0_13, %c0_14] : memref<4x2x256xf32, #tpu.memory_space<vmem>>, vector<4x1x256xf32>
    %18 = vector.shape_cast %17 : vector<4x1x256xf32> to vector<4x256xf32>
    %19 = vector.shape_cast %16 : vector<4x256xf32> to vector<4x1x256xf32>
    tpu.vector_store %arg4[%c0_12, %c0_13, %c0_14], %19 {strides = array<i32>} : memref<4x2x256xf32, #tpu.memory_space<vmem>>, vector<4x1x256xf32>,
    %c1_15 = arith.constant 1 : index
    %c0_16 = arith.constant 0 : index
    %20 = memref.load %arg2[%c1_15, %c0_16] : memref<2x3xf32, #tpu.memory_space<smem>>
    %21 = vector.broadcast %20 : f32 to vector<4x256xf32>
    %22 = arith.mulf %21, %1 : vector<4x256xf32>
    %c1_17 = arith.constant 1 : index
    %c1_18 = arith.constant 1 : index
    %23 = memref.load %arg2[%c1_17, %c1_18] : memref<2x3xf32, #tpu.memory_space<smem>>
    %24 = vector.broadcast %23 : f32 to vector<4x256xf32>
    %25 = arith.mulf %24, %3 : vector<4x256xf32>
    %26 = arith.addf %22, %25 : vector<4x256xf32>
    %c1_19 = arith.constant 1 : index
    %c2_20 = arith.constant 2 : index
    %27 = memref.load %arg2[%c1_19, %c2_20] : memref<2x3xf32, #tpu.memory_space<smem>>
    %28 = vector.broadcast %27 : f32 to vector<4x256xf32>
    %29 = arith.mulf %28, %5 : vector<4x256xf32>
    %30 = arith.addf %26, %29 : vector<4x256xf32>
    %c0_21 = arith.constant 0 : index
    %c1_22 = arith.constant 1 : index
    %c0_23 = arith.constant 0 : index
    %31 = vector.load %arg4[%c0_21, %c1_22, %c0_23] : memref<4x2x256xf32, #tpu.memory_space<vmem>>, vector<4x1x256xf32>
    %32 = vector.shape_cast %31 : vector<4x1x256xf32> to vector<4x256xf32>
    %33 = vector.shape_cast %30 : vector<4x256xf32> to vector<4x1x256xf32>
    tpu.vector_store %arg4[%c0_21, %c1_22, %c0_23], %33 {strides = array<i32>} : memref<4x2x256xf32, #tpu.memory_space<vmem>>, vector<4x1x256xf32>,
    return
  }
  func.func @transform_0(%arg0: i32, %arg1: i32) -> (i32, i32) {
    %c0_i32 = arith.constant 0 : i32
    %c0_i32_0 = arith.constant 0 : i32
    %c0_i32_1 = arith.constant 0 : i32
    return %c0_i32, %c0_i32_0 : i32, i32
  }
  func.func @transform_1(%arg0: i32, %arg1: i32) -> (i32, i32, i32) {
    %c0_i32 = arith.constant 0 : i32
    %c0_i32_0 = arith.constant 0 : i32
    return %arg0, %c0_i32, %arg1 : i32, i32, i32
  }
  func.func @transform_2(%arg0: i32, %arg1: i32) -> (i32, i32, i32) {
    %c0_i32 = arith.constant 0 : i32
    %c0_i32_0 = arith.constant 0 : i32
    return %arg0, %c0_i32, %arg1 : i32, i32, i32
  }
}

</mosaic_0001>

<bundles_post_ra>
// kernel: tpu_custom_call.1
= control target key start
LH: loop header
LB: loop body
LE: loop exit
PB: predicated region body
PF: predicated region fallthrough
CT: control target
= control target key end

     0   :  { %7 = vsyncpa [#allocation4], 0  ;;  %s284_s0 = inlined_call_operand.vmem [shape: f32[2,3], index: 0, kind: input, shape index: {}]   ;;  %s285_s1 = inlined_call_operand.vmem [shape: f32[4,3,256], index: 1, kind: input, shape index: {}]   ;;  %s286_s2 = inlined_call_operand.hbm [shape: f32[4,2,256], index: 2, kind: output, shape index: {}]  }
   0x1   :  { %8 = vsyncpa [#allocation3], 0  ;;  %s15_s11 = sshll.u32 %s284_s0, 4  ;;  %s16_s11 = int_to_ptr.vmem [resolvable:$true] %s15_s11 }
   0x2   :  { %s156_s12 = scalar_lea.vmem %s16_s11, 32  ;;  %p161_p1 = scmp.lt.s32.totalorder %s16_s11, %s16_s11 }
   0x3   :  { %p157_p0 = scmp.ne.s32.totalorder %s16_s11, %s156_s12  ;;  %p162_p2 = scmp.lt.s32.totalorder %s156_s12, %s156_s12 }
   0x5   :  { %p163_p3 = por %p162_p2, %p161_p1 }
   0x7   :  { %p164_p4 = pnand %p163_p3, %p157_p0 }
   0x9   :  { %167 = shalt.err (!%p164_p4)
}
   0xa   :  { %s194_s13 = smov [#allocation2]  }
   0xb   :  { %18 = dma.vmem_to_smem %s16_s11, 32, %s194_s13, [#allocation4]  }
   0xc   :  { %190 = dma.done.wait [#allocation4], 32  }
   0xd   :  { %191 = vsyncadd [#allocation4], 4294967264 }
   0xe   :  { %24 = sfence }
   0xf   :  { %s48_s14 = sld [smem:[#allocation2]]  ;;  %s147_s15 = sld [smem:[#allocation2 + $0x1]]  ;;  %v25_v0 = vld [vmem:[%s285_s1] ss:$4 sm:$0x3]  ;;  %v74_v12 = vlaneseq }
  0x10   :  { %s148_s16 = sld [smem:[#allocation2 + $0x2]]  ;;  %v136_v1 = vld [vmem:[%s285_s1 + $0x8] ss:$4 sm:$0x3]  ;;  %s149_s12 = sld [smem:[#allocation2 + $0x80]] }
  0x11   :  { %v139_v2 = vld [vmem:[%s285_s1 + $0x1] ss:$4 sm:$0x3]  ;;  %v143_v3 = vld [vmem:[%s285_s1 + $0x2] ss:$4 sm:$0x3] }
  0x12   :  { %v140_v4 = vld [vmem:[%s285_s1 + $0x9] ss:$4 sm:$0x3]  ;;  %v144_v5 = vld [vmem:[%s285_s1 + $0xa] ss:$4 sm:$0x3] }
  0x13   :  { %v137_v6 = vld [vmem:[%s285_s1 + $0x10] ss:$4 sm:$0x3]  ;;  %v141_v7 = vld [vmem:[%s285_s1 + $0x11] ss:$4 sm:$0x3] }
  0x14   :  { %v145_v8 = vld [vmem:[%s285_s1 + $0x12] ss:$4 sm:$0x3]  ;;  %v138_v9 = vld [vmem:[%s285_s1 + $0x18] ss:$4 sm:$0x3] }
  0x15   :  { %v142_v10 = vld [vmem:[%s285_s1 + $0x19] ss:$4 sm:$0x3]  ;;  %v49_v11 = vstv %s48_s14  ;;  %v146_v13 = vld [vmem:[%s285_s1 + $0x1a] ss:$4 sm:$0x3]  ;;  %v55_v15 = vstv %s147_s15 }
  0x16   :  { %v50_v14 = vmul.f32 %v49_v11, %v25_v0  ;;  %v65_v16 = vstv %s148_s16  ;;  %v51_v17 = vmul.f32 %v136_v1, %v49_v11  ;;  %s150_s13 = sld [smem:[#allocation2 + $0x81]]  ;;  %s151_s17 = sld [smem:[#allocation2 + $0x82]]  ;;  %v56_v18 = vmul.f32 %v139_v2, %v55_v15 }
  0x17   :  { %v66_v19 = vmul.f32 %v143_v3, %v65_v16  ;;  %v57_v20 = vmul.f32 %v140_v4, %v55_v15  ;;  %v67_v21 = vmul.f32 %v144_v5, %v65_v16  ;;  %v52_v22 = vmul.f32 %v137_v6, %v49_v11  ;;  %s195_s1 = smov [#allocation5]  }
  0x18   :  { %v58_v23 = vmul.f32 %v141_v7, %v55_v15  ;;  %v68_v24 = vmul.f32 %v145_v8, %v65_v16  ;;  %v53_v25 = vmul.f32 %v138_v9, %v49_v11  ;;  %v60_v26 = vadd.f32 %v56_v18, %v50_v14  ;;  %s124_s14 = sshll.u32 %s195_s1, 4  ;;  %s125_s14 = int_to_ptr.vmem [resolvable:$true] %s124_s14 }
  0x19   :  { %v61_v27 = vadd.f32 %v57_v20, %v51_v17  ;;  %v59_v28 = vmul.f32 %v142_v10, %v55_v15  ;;  %v69_v29 = vmul.f32 %v146_v13, %v65_v16  ;;  %vm252_vm0 = vcmp.lt.s32.totalorder %v74_v12, 256  ;;  %s168_s15 = scalar_lea.vmem %s125_s14, 256  ;;  %p173_p6 = scmp.lt.s32.totalorder %s125_s14, %s125_s14 }
  0x1a   :  { %v62_v31 = vadd.f32 %v58_v23, %v52_v22  ;;  %v70_v32 = vadd.f32 %v66_v19, %v60_v26  ;;  %v86_v35 = vstv %s149_s12  ;;  %p169_p5 = scmp.ne.s32.totalorder %s125_s14, %s168_s15  ;;  %p174_p7 = scmp.lt.s32.totalorder %s168_s15, %s168_s15 }
  0x1b   :  { %v71_v33 = vadd.f32 %v67_v21, %v61_v27  ;;  %v63_v34 = vadd.f32 %v59_v28, %v53_v25  ;;  %v87_v37 = vmul.f32 %v86_v35, %v25_v0  ;;  %v88_v43 = vmul.f32 %v136_v1, %v86_v35 }
  0x1c   :  { %v72_v36 = vadd.f32 %v68_v24, %v62_v31  ;;  %v92_v38 = vstv %s150_s13  ;;  %v102_v39 = vstv %s151_s17  ;;  %78 = vst.msk [vmem:[#allocation5] ss:$2 sm:$0x3] %vm252_vm0, %v70_v32  ;;  %v89_v46 = vmul.f32 %v137_v6, %v86_v35  ;;  %p175_p8 = por %p174_p7, %p173_p6 }
  0x1d   :  { %80 = vst.msk [vmem:[#allocation5 + $0x4] ss:$2 sm:$0x3] %vm252_vm0, %v71_v33  ;;  %v73_v40 = vadd.f32 %v69_v29, %v63_v34  ;;  %v93_v41 = vmul.f32 %v139_v2, %v92_v38  ;;  %v103_v42 = vmul.f32 %v143_v3, %v102_v39  ;;  %v94_v44 = vmul.f32 %v140_v4, %v92_v38 }
  0x1e   :  { %82 = vst.msk [vmem:[#allocation5 + $0x8] ss:$2 sm:$0x3] %vm252_vm0, %v72_v36  ;;  %v104_v45 = vmul.f32 %v144_v5, %v102_v39  ;;  %v95_v47 = vmul.f32 %v141_v7, %v92_v38  ;;  %v105_v49 = vmul.f32 %v145_v8, %v102_v39  ;;  %v90_v50 = vmul.f32 %v138_v9, %v86_v35  ;;  %p176_p9 = pnand %p175_p8, %p169_p5 }
  0x1f   :  { %84 = vst.msk [vmem:[#allocation5 + $0xc] ss:$2 sm:$0x3] %vm252_vm0, %v73_v40  ;;  %v97_v48 = vadd.f32 %v93_v41, %v87_v37  ;;  %v96_v51 = vmul.f32 %v142_v10, %v92_v38  ;;  %v98_v52 = vadd.f32 %v94_v44, %v88_v43  ;;  %v106_v54 = vmul.f32 %v146_v13, %v102_v39 }
  0x20   :  { %v99_v53 = vadd.f32 %v95_v47, %v89_v46 }
  0x21   :  { %v107_v55 = vadd.f32 %v103_v42, %v97_v48  ;;  %v100_v56 = vadd.f32 %v96_v51, %v90_v50  ;;  %v108_v57 = vadd.f32 %v104_v45, %v98_v52 }
  0x22   :  { %v109_v58 = vadd.f32 %v105_v49, %v99_v53 }
  0x23   :  { %112 = vst.msk [vmem:[#allocation5 + $0x1] ss:$2 sm:$0x3] %vm252_vm0, %v107_v55  ;;  %v110_v59 = vadd.f32 %v106_v54, %v100_v56  ;;  %114 = vst.msk [vmem:[#allocation5 + $0x5] ss:$2 sm:$0x3] %vm252_vm0, %v108_v57 }
  0x24   :  { %116 = vst.msk [vmem:[#allocation5 + $0x9] ss:$2 sm:$0x3] %vm252_vm0, %v109_v58 }
  0x25   :  { %118 = vst.msk [vmem:[#allocation5 + $0xd] ss:$2 sm:$0x3] %vm252_vm0, %v110_v59 }
  0x26   :  { %179 = shalt.err (!%p176_p9)
}
  0x27   :  { %s180_s0 = scalar_lea.hbm %s286_s2, 256 }
  0x28   :  { %p181_p10 = scmp.ne.s32.totalorder %s286_s2, %s180_s0  ;;  %p184_p11 = scmp.lt.u32.totalorder %s180_s0, %s286_s2 }
  0x2a   :  { %p186_p12 = pnand %p184_p11, %p181_p10 }
  0x2c   :  { %189 = shalt.err (!%p186_p12)
}
  0x2d   :  { %s196_s23 = smov 64   ;;  %s197_s24 = smov 4  }
  0x2e   :  { %130 = dma.vmem_to_hbm [thread:$0]  %s125_s14, 256, %s286_s2, [#allocation3], %s196_s23, %s196_s23, %s197_s24  }
  0x2f   :  { %192 = dma.done.wait [#allocation3], 256  }
  0x30   :  { %193 = vsyncadd [#allocation3], 4294967040 }
  0x31   :  { %134 = vsyncpa [#allocation3], 1 }
  0x32   :  { %135 = vsyncpa [#allocation4], 1 }

</bundles_post_ra>
